<compile_context>
chip_gen: v5e
topology: v5e:2x2
jax: 0.10.0
libtpu: 0.0.40
codegen_flags: <defaults>
</compile_context>

<pallas_src>
import functools

import jax
import jax.numpy as jnp
from jax.experimental import pallas as pl
from jax.experimental.pallas import tpu as pltpu


def _round_up(n, m):
    return ((n + m - 1) // m) * m


def _mlp_kernel(x_ref, w1_ref, b1_ref, w2_ref, b2_ref, out_ref, *,
                apply_softmax, valid_out):
    # x_ref:   (tb, input_dim)           f32 or bf16
    # w1_ref:  (input_dim, hidden_pad)   b1_ref: (1, hidden_pad)
    # w2_ref:  (hidden_pad, out_pad)     b2_ref: (1, out_pad)
    # out_ref: (tb, out_pad)             f32
    x = x_ref[...]

    # fc1 + ReLU (MXU matmul, f32 accumulation; no explicit up-cast of x).
    h = jnp.dot(x, w1_ref[...], preferred_element_type=jnp.float32) + b1_ref[...]
    h = jnp.maximum(h, 0.0).astype(w2_ref.dtype)

    # fc2
    o = jnp.dot(h, w2_ref[...], preferred_element_type=jnp.float32) + b2_ref[...]

    if apply_softmax:
        if valid_out != o.shape[-1]:
            # Exclude zero-padded class lanes from the softmax.
            lane = jax.lax.broadcasted_iota(jnp.int32, o.shape, 1)
            o = jnp.where(lane < valid_out, o, -jnp.inf)
        m = jnp.max(o, axis=-1, keepdims=True)
        e = jnp.exp(o - m)
        denom = jnp.sum(e, axis=-1, keepdims=True)
        o = e * pl.reciprocal(denom, approx=True)   # EUP vrcp, essentially free

    out_ref[...] = o.astype(out_ref.dtype)


def pad_params(w1, b1, w2, b2, *, param_dtype=jnp.float32):
    """Zero-pad hidden/output dims to multiples of 128 (lane-dense MXU/store
    tiles) and cast to `param_dtype`.  Padding is semantically neutral:
    padded hidden units compute relu(x @ 0 + 0) = 0 and feed zero rows of w2;
    padded class lanes are masked/sliced by the kernel/wrapper."""
    hid, out = w1.shape[1], w2.shape[1]
    hid_p, out_p = _round_up(hid, 128), _round_up(out, 128)
    w1p = jnp.pad(w1, ((0, 0), (0, hid_p - hid))).astype(param_dtype)
    b1p = jnp.pad(b1, (0, hid_p - hid)).reshape(1, hid_p).astype(param_dtype)
    w2p = jnp.pad(w2, ((0, hid_p - hid), (0, out_p - out))).astype(param_dtype)
    b2p = jnp.pad(b2, (0, out_p - out)).reshape(1, out_p).astype(param_dtype)
    return w1p, b1p, w2p, b2p


def mlp_forward(x, w1, b1, w2, b2, *, output_dim=None, apply_softmax=False,
                batch_tile=None):
    """Fused MLP forward.

    x: (B, input_dim).  w1: (input_dim, hidden_pad), b1: (1, hidden_pad),
    w2: (hidden_pad, out_pad), b2: (1, out_pad) -- build with pad_params().
    Returns (B, output_dim) float32.
    """
    B, input_dim = x.shape
    hidden_pad = w1.shape[1]
    out_pad = w2.shape[1]
    output_dim = out_pad if output_dim is None else output_dim
    assert w1.shape[0] == input_dim and w2.shape[0] == hidden_pad
    assert b1.shape == (1, hidden_pad) and b2.shape == (1, out_pad)

    # Batch tile: ~512 rows keeps x/out DMAs overlapped with MXU compute; for
    # small batches split into >= 2 tiles so both v7x TensorCores get work.
    if batch_tile is None:
        tb = min(512, _round_up(max(-(-B // 2), 8), 8))
    else:
        tb = max(8, _round_up(batch_tile, 8))
    Bp = _round_up(B, tb)
    if Bp != B:
        x = jnp.pad(x, ((0, Bp - B), (0, 0)))
    grid = Bp // tb

    kernel = functools.partial(_mlp_kernel, apply_softmax=apply_softmax,
                               valid_out=output_dim)

    # VMEM budget: resident weights (x2 covers the double-buffer fallback),
    # double-buffered x/out tiles, f32 intermediates, plus ~50% headroom.
    itm = lambda a: jnp.dtype(a.dtype).itemsize
    weight_bytes = (w1.size * itm(w1) + w2.size * itm(w2)
                    + b1.size * itm(b1) + b2.size * itm(b2))
    io_bytes = 2 * tb * input_dim * itm(x) + 2 * tb * out_pad * 4
    interm_bytes = tb * (hidden_pad + out_pad) * 4
    need = 2 * weight_bytes + io_bytes + interm_bytes
    vmem_limit = int(max(32 << 20, min(int(need * 1.5) + (4 << 20), 96 << 20)))

    cost = pl.CostEstimate(
        flops=2 * Bp * (input_dim * hidden_pad + hidden_pad * out_pad),
        transcendentals=Bp * out_pad if apply_softmax else 0,
        bytes_accessed=Bp * input_dim * itm(x) + weight_bytes + Bp * out_pad * 4,
    )

    def build(const_pipeline_mode):
        def const_spec(shape):
            if const_pipeline_mode is None:
                return pl.BlockSpec(shape, lambda i: (0, 0))
            return pl.BlockSpec(shape, lambda i: (0, 0),
                                pipeline_mode=const_pipeline_mode)

        grid_spec = pltpu.PrefetchScalarGridSpec(
            num_scalar_prefetch=0,
            grid=(grid,),
            in_specs=[
                pl.BlockSpec((tb, input_dim), lambda i: (i, 0)),   # x tile
                const_spec((input_dim, hidden_pad)),               # w1 (resident)
                const_spec((1, hidden_pad)),                       # b1
                const_spec((hidden_pad, out_pad)),                 # w2 (resident)
                const_spec((1, out_pad)),                          # b2
            ],
            out_specs=pl.BlockSpec((tb, out_pad), lambda i: (i, 0)),
        )
        return pl.pallas_call(
            kernel,
            out_shape=jax.ShapeDtypeStruct((Bp, out_pad), jnp.float32),
            grid_spec=grid_spec,
            compiler_params=pltpu.CompilerParams(
                dimension_semantics=("parallel",),
                vmem_limit_bytes=vmem_limit,
            ),
            cost_estimate=cost,
        )

    try:
        # Constant-index weight/bias blocks only need a single VMEM buffer.
        out = build(pl.Buffered(1))(x, w1, b1, w2, b2)
    except Exception:
        # Fallback if this lowering rejects single-buffered constant blocks:
        # default double-buffering (only costs 2x weight VMEM).
        out = build(None)(x, w1, b1, w2, b2)

    return out[:B, :output_dim]


def init_params(key, input_dim, hidden_dim, output_dim):
    """Deterministic init matching nn.Linear shapes (stored transposed, x @ W)."""
    k1, k2, k3, k4 = jax.random.split(key, 4)
    lim1 = 1.0 / jnp.sqrt(input_dim)
    lim2 = 1.0 / jnp.sqrt(hidden_dim)
    w1 = jax.random.uniform(k1, (input_dim, hidden_dim), jnp.float32, -lim1, lim1)
    b1 = jax.random.uniform(k2, (hidden_dim,), jnp.float32, -lim1, lim1)
    w2 = jax.random.uniform(k3, (hidden_dim, output_dim), jnp.float32, -lim2, lim2)
    b2 = jax.random.uniform(k4, (output_dim,), jnp.float32, -lim2, lim2)
    return w1, b1, w2, b2


if __name__ == "__main__":
    # Small news-classifier-ish shapes: 256 docs x 64 features -> 128 hidden -> 4 classes.
    B, INPUT_DIM, HIDDEN_DIM, OUTPUT_DIM = 256, 64, 128, 4

    key = jax.random.PRNGKey(0)
    kx, kp = jax.random.split(key)
    x = jax.random.normal(kx, (B, INPUT_DIM), jnp.float32)
    w1, b1, w2, b2 = init_params(kp, INPUT_DIM, HIDDEN_DIM, OUTPUT_DIM)

    # Pure-JAX reference (unpadded, f32).
    h_ref = jnp.maximum(x @ w1 + b1[None, :], 0.0)
    logits_ref = h_ref @ w2 + b2[None, :]
    probs_ref = jax.nn.softmax(logits_ref, axis=1)

    # f32 params (exact path).
    p32 = pad_params(w1, b1, w2, b2, param_dtype=jnp.float32)
    logits = mlp_forward(x, *p32, output_dim=OUTPUT_DIM, apply_softmax=False)
    probs = mlp_forward(x, *p32, output_dim=OUTPUT_DIM, apply_softmax=True)
    jax.block_until_ready((logits, probs))
    assert logits.shape == (B, OUTPUT_DIM) and probs.shape == (B, OUTPUT_DIM)
    assert jnp.allclose(logits, logits_ref, atol=1e-5, rtol=1e-5)
    # approx reciprocal in the softmax epilogue -> slightly looser tolerance.
    assert jnp.allclose(probs, probs_ref, atol=2e-3, rtol=2e-3)

    # bf16 params + bf16 activations (half the DMA bytes, f32 MXU accumulation).
    pbf = pad_params(w1, b1, w2, b2, param_dtype=jnp.bfloat16)
    logits_bf = mlp_forward(x.astype(jnp.bfloat16), *pbf, output_dim=OUTPUT_DIM)
    jax.block_until_ready(logits_bf)
    assert jnp.allclose(logits_bf, logits_ref, atol=5e-2, rtol=5e-2)

    print("KERNEL_OK")
</pallas_src>

<mosaic_0001>
module attributes {stable_mosaic.version = 11 : i64} {
  func.func @_mlp_kernel(%arg0: i32, %arg1: memref<128x64xf32, #tpu.memory_space<vmem>>, %arg2: memref<64x128xf32, #tpu.memory_space<vmem>>, %arg3: memref<1x128xf32, #tpu.memory_space<vmem>>, %arg4: memref<128x128xf32, #tpu.memory_space<vmem>>, %arg5: memref<1x128xf32, #tpu.memory_space<vmem>>, %arg6: memref<128x128xf32, #tpu.memory_space<vmem>>) attributes {dimension_semantics = [#tpu.dimension_semantics<parallel>], iteration_bounds = array<i64: 2>, scalar_prefetch = 0 : i64, scratch_operands = 0 : i64, tpu.core_type = #tpu.core_type<tc>, window_params = [{transform_indices = @transform_0, window_bounds = array<i64: 128, 64>}, {pipeline_mode = #tpu.pipeline_mode<synchronous>, transform_indices = @transform_1, window_bounds = array<i64: 64, 128>}, {pipeline_mode = #tpu.pipeline_mode<synchronous>, transform_indices = @transform_2, window_bounds = array<i64: 1, 128>}, {pipeline_mode = #tpu.pipeline_mode<synchronous>, transform_indices = @transform_3, window_bounds = array<i64: 128, 128>}, {pipeline_mode = #tpu.pipeline_mode<synchronous>, transform_indices = @transform_4, window_bounds = array<i64: 1, 128>}, {transform_indices = @transform_5, window_bounds = array<i64: 128, 128>}]} {
    %c0 = arith.constant 0 : index
    %c0_0 = arith.constant 0 : index
    %0 = vector.load %arg1[%c0, %c0_0] : memref<128x64xf32, #tpu.memory_space<vmem>>, vector<128x64xf32>
    %c0_1 = arith.constant 0 : index
    %c0_2 = arith.constant 0 : index
    %1 = vector.load %arg2[%c0_1, %c0_2] : memref<64x128xf32, #tpu.memory_space<vmem>>, vector<64x128xf32>
    %cst = arith.constant dense<0.000000e+00> : vector<128x128xf32>
    %2 = tpu.matmul %0, %1, %cst {dimension_numbers = #tpu.dot_dimension_numbers<[1], [0], [0], [1], [0, 0, 1, 1], [], []>} : vector<128x64xf32>, vector<64x128xf32>, vector<128x128xf32> -> vector<128x128xf32>
    %c0_3 = arith.constant 0 : index
    %c0_4 = arith.constant 0 : index
    %3 = vector.load %arg3[%c0_3, %c0_4] : memref<1x128xf32, #tpu.memory_space<vmem>>, vector<1x128xf32>
    %4 = vector.broadcast %3 : vector<1x128xf32> to vector<128x128xf32>
    %5 = arith.addf %2, %4 : vector<128x128xf32>
    %cst_5 = arith.constant 0.000000e+00 : f32
    %6 = vector.broadcast %cst_5 : f32 to vector<128x128xf32>
    %7 = arith.maximumf %5, %6 : vector<128x128xf32>
    %c0_6 = arith.constant 0 : index
    %c0_7 = arith.constant 0 : index
    %8 = vector.load %arg4[%c0_6, %c0_7] : memref<128x128xf32, #tpu.memory_space<vmem>>, vector<128x128xf32>
    %cst_8 = arith.constant dense<0.000000e+00> : vector<128x128xf32>
    %9 = tpu.matmul %7, %8, %cst_8 {dimension_numbers = #tpu.dot_dimension_numbers<[1], [0], [0], [1], [0, 0, 1, 1], [], []>} : vector<128x128xf32>, vector<128x128xf32>, vector<128x128xf32> -> vector<128x128xf32>
    %c0_9 = arith.constant 0 : index
    %c0_10 = arith.constant 0 : index
    %10 = vector.load %arg5[%c0_9, %c0_10] : memref<1x128xf32, #tpu.memory_space<vmem>>, vector<1x128xf32>
    %11 = vector.broadcast %10 : vector<1x128xf32> to vector<128x128xf32>
    %12 = arith.addf %9, %11 : vector<128x128xf32>
    %c0_11 = arith.constant 0 : index
    %c0_12 = arith.constant 0 : index
    %13 = vector.load %arg6[%c0_11, %c0_12] : memref<128x128xf32, #tpu.memory_space<vmem>>, vector<128x128xf32>
    tpu.vector_store %arg6[%c0_11, %c0_12], %12 {strides = array<i32>} : memref<128x128xf32, #tpu.memory_space<vmem>>, vector<128x128xf32>,
    return
  }
  func.func @transform_0(%arg0: i32) -> (i32, i32) {
    %c0_i32 = arith.constant 0 : i32
    %c0_i32_0 = arith.constant 0 : i32
    return %arg0, %c0_i32 : i32, i32
  }
  func.func @transform_1(%arg0: i32) -> (i32, i32) {
    %c0_i32 = arith.constant 0 : i32
    %c0_i32_0 = arith.constant 0 : i32
    %c0_i32_1 = arith.constant 0 : i32
    return %c0_i32, %c0_i32_0 : i32, i32
  }
  func.func @transform_2(%arg0: i32) -> (i32, i32) {
    %c0_i32 = arith.constant 0 : i32
    %c0_i32_0 = arith.constant 0 : i32
    %c0_i32_1 = arith.constant 0 : i32
    return %c0_i32, %c0_i32_0 : i32, i32
  }
  func.func @transform_3(%arg0: i32) -> (i32, i32) {
    %c0_i32 = arith.constant 0 : i32
    %c0_i32_0 = arith.constant 0 : i32
    %c0_i32_1 = arith.constant 0 : i32
    return %c0_i32, %c0_i32_0 : i32, i32
  }
  func.func @transform_4(%arg0: i32) -> (i32, i32) {
    %c0_i32 = arith.constant 0 : i32
    %c0_i32_0 = arith.constant 0 : i32
    %c0_i32_1 = arith.constant 0 : i32
    return %c0_i32, %c0_i32_0 : i32, i32
  }
  func.func @transform_5(%arg0: i32) -> (i32, i32) {
    %c0_i32 = arith.constant 0 : i32
    %c0_i32_0 = arith.constant 0 : i32
    return %arg0, %c0_i32 : i32, i32
  }
}

module attributes {stable_mosaic.version = 11 : i64} {
  func.func @_mlp_kernel(%arg0: i32, %arg1: memref<128x64xf32, #tpu.memory_space<vmem>>, %arg2: memref<64x128xf32, #tpu.memory_space<vmem>>, %arg3: memref<1x128xf32, #tpu.memory_space<vmem>>, %arg4: memref<128x128xf32, #tpu.memory_space<vmem>>, %arg5: memref<1x128xf32, #tpu.memory_space<vmem>>, %arg6: memref<128x128xf32, #tpu.memory_space<vmem>>) attributes {dimension_semantics = [#tpu.dimension_semantics<parallel>], iteration_bounds = array<i64: 2>, scalar_prefetch = 0 : i64, scratch_operands = 0 : i64, tpu.core_type = #tpu.core_type<tc>, window_params = [{transform_indices = @transform_0, window_bounds = array<i64: 128, 64>}, {pipeline_mode = #tpu.pipeline_mode<synchronous>, transform_indices = @transform_1, window_bounds = array<i64: 64, 128>}, {pipeline_mode = #tpu.pipeline_mode<synchronous>, transform_indices = @transform_2, window_bounds = array<i64: 1, 128>}, {pipeline_mode = #tpu.pipeline_mode<synchronous>, transform_indices = @transform_3, window_bounds = array<i64: 128, 128>}, {pipeline_mode = #tpu.pipeline_mode<synchronous>, transform_indices = @transform_4, window_bounds = array<i64: 1, 128>}, {transform_indices = @transform_5, window_bounds = array<i64: 128, 128>}]} {
    %c0 = arith.constant 0 : index
    %c0_0 = arith.constant 0 : index
    %0 = vector.load %arg1[%c0, %c0_0] : memref<128x64xf32, #tpu.memory_space<vmem>>, vector<128x64xf32>
    %c0_1 = arith.constant 0 : index
    %c0_2 = arith.constant 0 : index
    %1 = vector.load %arg2[%c0_1, %c0_2] : memref<64x128xf32, #tpu.memory_space<vmem>>, vector<64x128xf32>
    %cst = arith.constant dense<0.000000e+00> : vector<128x128xf32>
    %2 = tpu.matmul %0, %1, %cst {dimension_numbers = #tpu.dot_dimension_numbers<[1], [0], [0], [1], [0, 0, 1, 1], [], []>} : vector<128x64xf32>, vector<64x128xf32>, vector<128x128xf32> -> vector<128x128xf32>
    %c0_3 = arith.constant 0 : index
    %c0_4 = arith.constant 0 : index
    %3 = vector.load %arg3[%c0_3, %c0_4] : memref<1x128xf32, #tpu.memory_space<vmem>>, vector<1x128xf32>
    %4 = vector.broadcast %3 : vector<1x128xf32> to vector<128x128xf32>
    %5 = arith.addf %2, %4 : vector<128x128xf32>
    %cst_5 = arith.constant 0.000000e+00 : f32
    %6 = vector.broadcast %cst_5 : f32 to vector<128x128xf32>
    %7 = arith.maximumf %5, %6 : vector<128x128xf32>
    %c0_6 = arith.constant 0 : index
    %c0_7 = arith.constant 0 : index
    %8 = vector.load %arg4[%c0_6, %c0_7] : memref<128x128xf32, #tpu.memory_space<vmem>>, vector<128x128xf32>
    %cst_8 = arith.constant dense<0.000000e+00> : vector<128x128xf32>
    %9 = tpu.matmul %7, %8, %cst_8 {dimension_numbers = #tpu.dot_dimension_numbers<[1], [0], [0], [1], [0, 0, 1, 1], [], []>} : vector<128x128xf32>, vector<128x128xf32>, vector<128x128xf32> -> vector<128x128xf32>
    %c0_9 = arith.constant 0 : index
    %c0_10 = arith.constant 0 : index
    %10 = vector.load %arg5[%c0_9, %c0_10] : memref<1x128xf32, #tpu.memory_space<vmem>>, vector<1x128xf32>
    %11 = vector.broadcast %10 : vector<1x128xf32> to vector<128x128xf32>
    %12 = arith.addf %9, %11 : vector<128x128xf32>
    %c0_11 = arith.constant 0 : index
    %c0_12 = arith.constant 0 : index
    %13 = vector.load %arg6[%c0_11, %c0_12] : memref<128x128xf32, #tpu.memory_space<vmem>>, vector<128x128xf32>
    tpu.vector_store %arg6[%c0_11, %c0_12], %12 {strides = array<i32>} : memref<128x128xf32, #tpu.memory_space<vmem>>, vector<128x128xf32>,
    return
  }
  func.func @transform_0(%arg0: i32) -> (i32, i32) {
    %c0_i32 = arith.constant 0 : i32
    %c0_i32_0 = arith.constant 0 : i32
    return %arg0, %c0_i32 : i32, i32
  }
  func.func @transform_1(%arg0: i32) -> (i32, i32) {
    %c0_i32 = arith.constant 0 : i32
    %c0_i32_0 = arith.constant 0 : i32
    %c0_i32_1 = arith.constant 0 : i32
    return %c0_i32, %c0_i32_0 : i32, i32
  }
  func.func @transform_2(%arg0: i32) -> (i32, i32) {
    %c0_i32 = arith.constant 0 : i32
    %c0_i32_0 = arith.constant 0 : i32
    %c0_i32_1 = arith.constant 0 : i32
    return %c0_i32, %c0_i32_0 : i32, i32
  }
  func.func @transform_3(%arg0: i32) -> (i32, i32) {
    %c0_i32 = arith.constant 0 : i32
    %c0_i32_0 = arith.constant 0 : i32
    %c0_i32_1 = arith.constant 0 : i32
    return %c0_i32, %c0_i32_0 : i32, i32
  }
  func.func @transform_4(%arg0: i32) -> (i32, i32) {
    %c0_i32 = arith.constant 0 : i32
    %c0_i32_0 = arith.constant 0 : i32
    %c0_i32_1 = arith.constant 0 : i32
    return %c0_i32, %c0_i32_0 : i32, i32
  }
  func.func @transform_5(%arg0: i32) -> (i32, i32) {
    %c0_i32 = arith.constant 0 : i32
    %c0_i32_0 = arith.constant 0 : i32
    return %arg0, %c0_i32 : i32, i32
  }
}

</mosaic_0001>

<bundles_post_ra>
// kernel: tpu_custom_call.1
= control target key start
LH: loop header
LB: loop body
LE: loop exit
PB: predicated region body
PF: predicated region fallthrough
CT: control target
= control target key end

     0   :  { %10 = vsyncpa [#allocation3], 0  ;;  %s990_s0 = inlined_call_operand.vmem [shape: f32[256,64], index: 0, kind: input, shape index: {}]   ;;  %s991_s1 = inlined_call_operand.vmem [shape: f32[64,128], index: 1, kind: input, shape index: {}]   ;;  %s992_s2 = inlined_call_operand.vmem [shape: f32[1,128], index: 2, kind: input, shape index: {}]   ;;  %s993_s3 = inlined_call_operand.vmem [shape: f32[128,128], index: 3, kind: input, shape index: {}]   ;;  %s994_s4 = inlined_call_operand.vmem [shape: f32[1,128], index: 4, kind: input, shape index: {}]   ;;  %s995_s5 = inlined_call_operand.hbm [shape: f32[256,128], index: 5, kind: output, shape index: {}]  }
   0x1   :  { %12 = vsyncpa [#allocation3 + $0x1], 0  ;;  %s771_s18 = smov 0   ;;  %s773_s19 = smov 0  }
   0x2   :  { %s775_s20 = smov 0   ;;  %s777_s21 = smov 0  }
   0x3 LB: > { %s792_s22 = sadd.s32 4294967295, %s737_s21   ;;  %s563_s23 = sadd.s32 4294967294, %s737_s21   ;;  %s737_s21 = sphi %s777_s21, %s1001_s21   ;;  %s733_s20 = sphi %s775_s20, %s1000_s20   ;;  %s729_s19 = sphi %s773_s19, %s999_s19   ;;  %s725_s18 = sphi %s771_s18, %s998_s18  }
   0x4   : > { %s796_s24 = sadd.s32 1, %s737_s21   ;;  %s135_s25 = sadd.s32 1, %s733_s20 }
   0x5   : > { %s132_s26 = ssub.s32 %s737_s21, %s796_s24  ;;  %p145_p0 = scmp.ne.s32.totalorder %s733_s20, %s729_s19 }
   0x6   : > { %p133_p1 = scmp.eq.s32.totalorder %s132_s26, 0  ;;  %p146_p2 = scmp.eq.s32.totalorder %s792_s22, 1 }
   0x7   : > { %p151_p3 = scmp.ne.s32.totalorder %s729_s19, %s725_s18  ;;  %p152_p4 = scmp.eq.s32.totalorder %s563_s23, 1 }
   0x8   : > { %s807_s27 = scalar_select %p133_p1, %s733_s20, %s135_s25  }
   0x9   : > { %p809_p5 = por %p146_p2, %p145_p0  ;;  %p813_p6 = por %p152_p4, %p151_p3 }
   0xa   : > { %p566_p7 = scmp.ge.s32.totalorder %s737_s21, 1  ;;  %p191_p8 = scmp.lt.s32.totalorder %s737_s21, 3 }
   0xc   : > { %p192_p9 = pnand %p566_p7, %p191_p8 }
   0xd   : > { %s568_s9 = sshll.u32 (!%p192_p9), %s792_s22, 4  ;;  %s216_s13 = sand.u32 (!%p192_p9), 1, %s729_s19  }
   0xe   : > { %195 = sbr.rel (%p192_p9) target bundleno = 407 (0x197), region = 40  ;;  %p220_p10 = scmp.lt.s32.totalorder (!%p192_p9), %s568_s9, 31 }
   0xf   : > { %s567_s14 = sshll.u32 (!%p192_p9), %s216_s13, 7  ;;  %s591_s23 = sshll.u32 (!%p192_p9), %s792_s22, 7 }
  0x10   : > { %s938_s17 = scalar_lea.vmem (!%p192_p9), [#allocation2], %s567_s14  ;;  %s497_s30 = scalar_lea.hbm (!%p192_p9), %s995_s5, %s591_s23 }
  0x11   : > { %s498_s6 = sshll.u32 (!%p192_p9), %s938_s17, 4  ;;  %s500_s8 = sshll.u32 (!%p192_p9), %s497_s30, 4  ;;  %s499_s6 = int_to_ptr.vmem [resolvable:$true] %s498_s6  ;;  %s501_s8 = int_to_ptr.hbm [resolvable:$true] %s500_s8 }
  0x12   : > { %s695_s12 = scalar_lea.hbm (!%p192_p9), %s995_s5, 256 }
  0x13   : > { %v249_v0 = vld [vmem:[%s991_s1 + $0x38] sm:$0xff]  ;;  %v248_v1 = vld [vmem:[%s991_s1 + $0x30] sm:$0xff]  ;;  %v247_v2 = vld [vmem:[%s991_s1 + $0x28] sm:$0xff]  ;;  %s1003_s9 = smov (!%p220_p10, %s568_s9), 31  ;;  %vm254_vm0 = vcmask 523264  }
  0x14   : > { %311 = vmatpush.msra.mxu0 %v249_v0  ;;  %592 = vmatpush.msra.mxu3 %v249_v0  ;;  %v246_v3 = vld [vmem:[%s991_s1 + $0x20] sm:$0xff]  ;;  %v245_v4 = vld [vmem:[%s991_s1 + $0x18] sm:$0xff]  ;;  %s569_s16 = sshll.u32 %s1003_s9, 3  ;;  %v244_v5 = vld [vmem:[%s991_s1 + $0x10] sm:$0xff]  ;;  %s486_s9 = scalar_lea.sflag [#allocation3], %s216_s13 }
  0x15   : > { %v243_v6 = vld [vmem:[%s991_s1 + $0x8] sm:$0xff]  ;;  %s844_s7 = scalar_lea.vmem %s990_s0, %s569_s16  ;;  %v242_v7 = vld [vmem:[%s991_s1] sm:$0xff]  ;;  %v399_v16 = vld [vmem:[%s993_s3 + $0x78] sm:$0xff] }
  0x16   : > { %312 = vmatpush.msra.mxu0 %v248_v1  ;;  %593 = vmatpush.msra.mxu3 %v248_v1  ;;  %v226_v8 = vld [vmem:[%s844_s7] sm:$0xff]  ;;  %v227_v9 = vld [vmem:[%s844_s7 + $0x8] sm:$0xff]  ;;  %v228_v10 = vld [vmem:[%s844_s7 + $0x10] sm:$0xff] }
  0x17   : > { %v235_v11 = vld [vmem:[%s844_s7 + $0x48] sm:$0xff]  ;;  %v229_v12 = vld [vmem:[%s844_s7 + $0x18] sm:$0xff]  ;;  %v236_v13 = vld [vmem:[%s844_s7 + $0x50] sm:$0xff]  ;;  %404 = vmatpush.msra.mxu1 %v399_v16  ;;  %600 = vmatpush.msra.mxu2 %v399_v16 }
  0x18   : > { %313 = vmatpush.msra.mxu0 %v247_v2  ;;  %594 = vmatpush.msra.mxu3 %v247_v2  ;;  %v230_v14 = vld [vmem:[%s844_s7 + $0x20] sm:$0xff]  ;;  %v237_v15 = vld [vmem:[%s844_s7 + $0x58] sm:$0xff]  ;;  %v398_v17 = vld [vmem:[%s993_s3 + $0x70] sm:$0xff] }
  0x19   : > { %v397_v18 = vld [vmem:[%s993_s3 + $0x68] sm:$0xff]  ;;  %405 = vmatpush.msra.mxu1 %v398_v17  ;;  %602 = vmatpush.msra.mxu2 %v398_v17  ;;  %v396_v20 = vld [vmem:[%s993_s3 + $0x60] sm:$0xff]  ;;  %v395_v22 = vld [vmem:[%s993_s3 + $0x58] sm:$0xff] }
  0x1a   : > { %314 = vmatpush.msra.mxu0 %v246_v3  ;;  %595 = vmatpush.msra.mxu3 %v246_v3  ;;  %v231_v19 = vld [vmem:[%s844_s7 + $0x28] sm:$0xff]  ;;  %v238_v21 = vld [vmem:[%s844_s7 + $0x60] sm:$0xff]  ;;  %v394_v23 = vld [vmem:[%s993_s3 + $0x50] sm:$0xff] }
  0x1b   : > { %406 = vmatpush.msra.mxu1 %v397_v18  ;;  %604 = vmatpush.msra.mxu2 %v397_v18  ;;  %v393_v24 = vld [vmem:[%s993_s3 + $0x48] sm:$0xff]  ;;  %v232_v25 = vld [vmem:[%s844_s7 + $0x30] sm:$0xff]  ;;  %v392_v26 = vld [vmem:[%s993_s3 + $0x40] sm:$0xff] }
  0x1c   : > { %315 = vmatpush.msra.mxu0 %v245_v4  ;;  %596 = vmatpush.msra.mxu3 %v245_v4  ;;  %v239_v27 = vld [vmem:[%s844_s7 + $0x68] sm:$0xff]  ;;  %v391_v28 = vld [vmem:[%s993_s3 + $0x38] sm:$0xff]  ;;  %v390_v29 = vld [vmem:[%s993_s3 + $0x30] sm:$0xff] }
  0x1d   : > { %407 = vmatpush.msra.mxu1 %v396_v20  ;;  %606 = vmatpush.msra.mxu2 %v396_v20  ;;  %v389_v30 = vld [vmem:[%s993_s3 + $0x28] sm:$0xff]  ;;  %v233_v31 = vld [vmem:[%s844_s7 + $0x38] sm:$0xff]  ;;  %v388_v32 = vld [vmem:[%s993_s3 + $0x20] sm:$0xff] }
  0x1e   : > { %316 = vmatpush.msra.mxu0 %v244_v5  ;;  %597 = vmatpush.msra.mxu3 %v244_v5  ;;  %v240_v33 = vld [vmem:[%s844_s7 + $0x70] sm:$0xff]  ;;  %v387_v34 = vld [vmem:[%s993_s3 + $0x18] sm:$0xff]  ;;  %v234_v35 = vld [vmem:[%s844_s7 + $0x40] sm:$0xff] }
  0x1f   : > { %408 = vmatpush.msra.mxu1 %v395_v22  ;;  %608 = vmatpush.msra.mxu2 %v395_v22  ;;  %v241_v36 = vld [vmem:[%s844_s7 + $0x78] sm:$0xff]  ;;  %v386_v37 = vld [vmem:[%s993_s3 + $0x10] sm:$0xff]  ;;  %v385_v38 = vld [vmem:[%s993_s3 + $0x8] sm:$0xff]  ;;  %s689_s7 = sshra.s32 %s501_s8, 4  ;;  %s690_s7 = int_to_ptr.hbm [resolvable:$true] %s689_s7 }
  0x20   : > { %317 = vmatpush.msra.mxu0 %v243_v6  ;;  %598 = vmatpush.msra.mxu3 %v243_v6  ;;  %v384_v39 = vld [vmem:[%s993_s3] sm:$0xff]  ;;  %s691_s22 = scalar_lea.hbm %s690_s7, 128  ;;  %p696_p0 = scmp.lt.s32.totalorder %s690_s7, %s995_s5 }
  0x21   : > { %409 = vmatpush.msra.mxu1 %v394_v23  ;;  %610 = vmatpush.msra.mxu2 %v394_v23  ;;  %v673_v40 = vld [vmem:[%s992_s2] ss:$0 sm:$0xff]  ;;  %p692_p11 = scmp.ne.s32.totalorder %s690_s7, %s691_s22  ;;  %p697_p1 = scmp.lt.s32.totalorder %s695_s12, %s691_s22 }
  0x22   : > { %318 = vmatpush.msra.mxu0 %v242_v7  ;;  %599 = vmatpush.msra.mxu3 %v242_v7 }
  0x23   : > { %570 = vmatmul.msk.f32.vlgmr.msra.gmra.mxu0 %vm254_vm0, %v226_v8  ;;  %579 = vmatmul.msk.f32.vlgmr.msra.gmra.mxu3 %vm254_vm0, %v235_v11  ;;  %p693_p12 = pnand %p692_p11, %p809_p5  ;;  %p698_p2 = por %p697_p1, %p696_p0 }
  0x24   : > { %601 = vmatpush.msrb.mxu3 %v399_v16  ;;  %410 = vmatpush.msra.mxu1 %v393_v24 }
  0x25   : > { %612 = vmatpush.msra.mxu2 %v393_v24  ;;  %p694_p13 = pneg %p693_p12 }
  0x26   : > { %603 = vmatpush.msrb.mxu3 %v398_v17  ;;  %411 = vmatpush.msra.mxu1 %v392_v26 }
  0x27   : > { %614 = vmatpush.msra.mxu2 %v392_v26  ;;  %p699_p3 = pnand %p698_p2, %p694_p13 }
  0x28   : > { %605 = vmatpush.msrb.mxu3 %v397_v18  ;;  %412 = vmatpush.msra.mxu1 %v391_v28 }
  0x29   : > { %616 = vmatpush.msra.mxu2 %v391_v28 }
  0x2a   : > { %607 = vmatpush.msrb.mxu3 %v396_v20  ;;  %413 = vmatpush.msra.mxu1 %v390_v29 }
  0x2b   : > { %571 = vmatmul.msk.f32.gmra.mxu0 %vm254_vm0, %v227_v9  ;;  %580 = vmatmul.msk.f32.gmra.mxu3 %vm254_vm0, %v236_v13 }
  0x2c   : > { %609 = vmatpush.msrb.mxu3 %v395_v22  ;;  %618 = vmatpush.msra.mxu2 %v390_v29 }
  0x2d   : > { %414 = vmatpush.msra.mxu1 %v389_v30 }
  0x2e   : > { %611 = vmatpush.msrb.mxu3 %v394_v23  ;;  %620 = vmatpush.msra.mxu2 %v389_v30 }
  0x2f   : > { %415 = vmatpush.msra.mxu1 %v388_v32 }
  0x30   : > { %613 = vmatpush.msrb.mxu3 %v393_v24  ;;  %622 = vmatpush.msra.mxu2 %v388_v32 }
  0x31   : > { %416 = vmatpush.msra.mxu1 %v387_v34 }
  0x32   : > { %615 = vmatpush.msrb.mxu3 %v392_v26  ;;  %624 = vmatpush.msra.mxu2 %v387_v34 }
  0x33   : > { %572 = vmatmul.msk.f32.gmra.mxu0 %vm254_vm0, %v228_v10  ;;  %581 = vmatmul.msk.f32.gmra.mxu3 %vm254_vm0, %v237_v15 }
  0x34   : > { %617 = vmatpush.msrb.mxu3 %v391_v28  ;;  %417 = vmatpush.msra.mxu1 %v386_v37 }
  0x35   : > { %626 = vmatpush.msra.mxu2 %v386_v37 }
  0x36   : > { %619 = vmatpush.msrb.mxu3 %v390_v29  ;;  %418 = vmatpush.msra.mxu1 %v385_v38 }
  0x37   : > { %628 = vmatpush.msra.mxu2 %v385_v38 }
  0x38   : > { %621 = vmatpush.msrb.mxu3 %v389_v30  ;;  %419 = vmatpush.msra.mxu1 %v384_v39 }
  0x39   : > { %630 = vmatpush.msra.mxu2 %v384_v39 }
  0x3a   : > { %623 = vmatpush.msrb.mxu3 %v388_v32 }
  0x3b   : > { %573 = vmatmul.msk.f32.gmra.mxu0 %vm254_vm0, %v229_v12  ;;  %582 = vmatmul.msk.f32.gmra.mxu3 %vm254_vm0, %v238_v21 }
  0x3c   : > { %625 = vmatpush.msrb.mxu3 %v387_v34 }
  0x3e   : > { %627 = vmatpush.msrb.mxu3 %v386_v37 }
  0x40   : > { %629 = vmatpush.msrb.mxu3 %v385_v38 }
  0x42   : > { %631 = vmatpush.msrb.mxu3 %v384_v39 }
  0x43   : > { %574 = vmatmul.msk.f32.gmra.mxu0 %vm254_vm0, %v230_v14  ;;  %583 = vmatmul.msk.f32.gmra.mxu3 %vm254_vm0, %v239_v27 }
  0x4b   : > { %575 = vmatmul.msk.f32.gmra.mxu0 %vm254_vm0, %v231_v19  ;;  %584 = vmatmul.msk.f32.gmra.mxu3 %vm254_vm0, %v240_v33 }
  0x53   : > { %576 = vmatmul.msk.f32.gmra.mxu0 %vm254_vm0, %v232_v25  ;;  %585 = vmatmul.msk.f32.gmra.mxu3 %vm254_vm0, %v241_v36  ;;  %v674_v25 = vld [vmem:[%s994_s4] ss:$0 sm:$0xff] }
  0x5b   : > { %577 = vmatmul.msk.f32.gmra.mxu0 %vm254_vm0, %v233_v31 }
  0x63   : > { %578 = vmatmul.msk.f32.gmra.mxu0 %vm254_vm0, %v234_v35 }
  0xa0   : > { %v320_v41 = vpop.f32.mrf.mxu0 }
  0xa1   : > { %v321_v42 = vadd.f32 %v673_v40, %v320_v41 }
  0xa3   : > { %v368_v43 = vmax.f32 %v321_v42, 0.0 }
  0xa5   : > { %420 = vmatmul.f32.vlgmr.msra.gmra.mxu1 %v368_v43 }
  0xa6   : > { %v347_v51 = vpop.f32.mrf.mxu3 }
  0xa7   : > { %v348_v12 = vadd.f32 %v673_v40, %v347_v51 }
  0xa8   : > { %v323_v44 = vpop.f32.mrf.mxu0 }
  0xa9   : > { %v324_v45 = vadd.f32 %v673_v40, %v323_v44  ;;  %v377_v15 = vmax.f32 %v348_v12, 0.0 }
  0xab   : > { %v369_v46 = vmax.f32 %v324_v45, 0.0 }
  0xad   : > { %423 = vmatmul.f32.gmra.mxu1 %v369_v46 }
  0xae   : > { %v350_v55 = vpop.f32.mrf.mxu3 }
  0xaf   : > { %v351_v17 = vadd.f32 %v673_v40, %v350_v55 }
  0xb0   : > { %v326_v47 = vpop.f32.mrf.mxu0 }
  0xb1   : > { %v327_v48 = vadd.f32 %v673_v40, %v326_v47  ;;  %v378_v18 = vmax.f32 %v351_v17, 0.0 }
  0xb3   : > { %v370_v49 = vmax.f32 %v327_v48, 0.0 }
  0xb5   : > { %426 = vmatmul.f32.gmra.mxu1 %v370_v49 }
  0xb6   : > { %v353_v59 = vpop.f32.mrf.mxu3 }
  0xb7   : > { %v354_v19 = vadd.f32 %v673_v40, %v353_v59 }
  0xb8   : > { %v329_v50 = vpop.f32.mrf.mxu0 }
  0xb9   : > { %v330_v52 = vadd.f32 %v673_v40, %v329_v50  ;;  %v379_v20 = vmax.f32 %v354_v19, 0.0 }
  0xbb   : > { %v371_v53 = vmax.f32 %v330_v52, 0.0 }
  0xbd   : > { %429 = vmatmul.f32.gmra.mxu1 %v371_v53 }
  0xbe   : > { %v356_v63 = vpop.f32.mrf.mxu3 }
  0xbf   : > { %v357_v21 = vadd.f32 %v673_v40, %v356_v63 }
  0xc0   : > { %v332_v54 = vpop.f32.mrf.mxu0 }
  0xc1   : > { %v333_v56 = vadd.f32 %v673_v40, %v332_v54  ;;  %v380_v22 = vmax.f32 %v357_v21, 0.0 }
  0xc3   : > { %v372_v57 = vmax.f32 %v333_v56, 0.0 }
  0xc5   : > { %432 = vmatmul.f32.gmra.mxu1 %v372_v57 }
  0xc6   : > { %v359_v3 = vpop.f32.mrf.mxu3 }
  0xc7   : > { %v360_v23 = vadd.f32 %v673_v40, %v359_v3 }
  0xc8   : > { %v335_v58 = vpop.f32.mrf.mxu0 }
  0xc9   : > { %v336_v60 = vadd.f32 %v673_v40, %v335_v58  ;;  %v381_v24 = vmax.f32 %v360_v23, 0.0 }
  0xcb   : > { %v373_v61 = vmax.f32 %v336_v60, 0.0 }
  0xcd   : > { %435 = vmatmul.f32.gmra.mxu1 %v373_v61 }
  0xce   : > { %v362_v7 = vpop.f32.mrf.mxu3 }
  0xcf   : > { %v363_v9 = vadd.f32 %v673_v40, %v362_v7 }
  0xd0   : > { %v338_v62 = vpop.f32.mrf.mxu0 }
  0xd1   : > { %v339_v0 = vadd.f32 %v673_v40, %v338_v62  ;;  %v382_v11 = vmax.f32 %v363_v9, 0.0 }
  0xd3   : > { %v374_v1 = vmax.f32 %v339_v0, 0.0  ;;  %462 = vmatmul.f32.vlgmr.msrb.gmra.mxu3 %v382_v11 }
  0xd5   : > { %438 = vmatmul.f32.gmra.mxu1 %v374_v1 }
  0xd6   : > { %v365_v13 = vpop.f32.mrf.mxu3 }
  0xd7   : > { %v366_v14 = vadd.f32 %v673_v40, %v365_v13 }
  0xd8   : > { %v341_v2 = vpop.f32.mrf.mxu0 }
  0xd9   : > { %v342_v4 = vadd.f32 %v673_v40, %v341_v2  ;;  %v383_v16 = vmax.f32 %v366_v14, 0.0 }
  0xdb   : > { %v375_v5 = vmax.f32 %v342_v4, 0.0  ;;  %465 = vmatmul.f32.gmra.mxu3 %v383_v16 }
  0xdd   : > { %441 = vmatmul.f32.vlgmr.msra.gmra.mxu2 %v375_v5 }
  0xe0   : > { %v344_v6 = vpop.f32.mrf.mxu0 }
  0xe1   : > { %v345_v8 = vadd.f32 %v673_v40, %v344_v6 }
  0xe3   : > { %v376_v10 = vmax.f32 %v345_v8, 0.0 }
  0xe5   : > { %444 = vmatmul.f32.gmra.mxu2 %v376_v10 }
  0xed   : > { %447 = vmatmul.f32.gmra.mxu2 %v377_v15 }
  0xf5   : > { %450 = vmatmul.f32.gmra.mxu2 %v378_v18 }
  0xfd   : > { %453 = vmatmul.f32.gmra.mxu2 %v379_v20 }
 0x105   : > { %456 = vmatmul.f32.gmra.mxu2 %v380_v22 }
 0x10d   : > { %459 = vmatmul.f32.gmra.mxu2 %v381_v24 }
 0x122   : > { %v421_v26 = vpop.f32.mrf.mxu1 }
 0x123   : > { %v422_v27 = vadd.f32 %v674_v25, %v421_v26 }
 0x125   : > { %469 = vst [vmem:[%s938_s17] sm:$0xff] %v422_v27 }
 0x12a   : > { %v424_v28 = vpop.f32.mrf.mxu1 }
 0x12b   : > { %v425_v29 = vadd.f32 %v674_v25, %v424_v28 }
 0x12d   : > { %470 = vst [vmem:[%s938_s17 + $0x8] sm:$0xff] %v425_v29 }
 0x132   : > { %v427_v30 = vpop.f32.mrf.mxu1 }
 0x133   : > { %v428_v31 = vadd.f32 %v674_v25, %v427_v30 }
 0x135   : > { %471 = vst [vmem:[%s938_s17 + $0x10] sm:$0xff] %v428_v31 }
 0x13a   : > { %v430_v32 = vpop.f32.mrf.mxu1 }
 0x13b   : > { %v431_v33 = vadd.f32 %v674_v25, %v430_v32 }
 0x13d   : > { %472 = vst [vmem:[%s938_s17 + $0x18] sm:$0xff] %v431_v33 }
 0x142   : > { %v433_v34 = vpop.f32.mrf.mxu1 }
 0x143   : > { %v434_v35 = vadd.f32 %v674_v25, %v433_v34 }
 0x145   : > { %473 = vst [vmem:[%s938_s17 + $0x20] sm:$0xff] %v434_v35 }
 0x14a   : > { %v436_v36 = vpop.f32.mrf.mxu1 }
 0x14b   : > { %v437_v37 = vadd.f32 %v674_v25, %v436_v36 }
 0x14d   : > { %474 = vst [vmem:[%s938_s17 + $0x28] sm:$0xff] %v437_v37 }
 0x152   : > { %v439_v38 = vpop.f32.mrf.mxu1 }
 0x153   : > { %v440_v39 = vadd.f32 %v674_v25, %v439_v38 }
 0x155   : > { %475 = vst [vmem:[%s938_s17 + $0x30] sm:$0xff] %v440_v39 }
 0x156   : > { %v463_v43 = vpop.f32.mrf.mxu3 }
 0x157   : > { %v464_v45 = vadd.f32 %v674_v25, %v463_v43 }
 0x159   : > { %483 = vst [vmem:[%s938_s17 + $0x70] sm:$0xff] %v464_v45 }
 0x15e   : > { %v466_v47 = vpop.f32.mrf.mxu3 }
 0x15f   : > { %v467_v49 = vadd.f32 %v674_v25, %v466_v47 }
 0x160   : > { %v442_v40 = vpop.f32.mrf.mxu2 }
 0x161   : > { %v443_v41 = vadd.f32 %v674_v25, %v442_v40  ;;  %484 = vst [vmem:[%s938_s17 + $0x78] sm:$0xff] %v467_v49 }
 0x163   : > { %476 = vst [vmem:[%s938_s17 + $0x38] sm:$0xff] %v443_v41 }
 0x168   : > { %v445_v42 = vpop.f32.mrf.mxu2 }
 0x169   : > { %v446_v44 = vadd.f32 %v674_v25, %v445_v42 }
 0x16b   : > { %477 = vst [vmem:[%s938_s17 + $0x40] sm:$0xff] %v446_v44 }
 0x170   : > { %v448_v46 = vpop.f32.mrf.mxu2 }
 0x171   : > { %v449_v48 = vadd.f32 %v674_v25, %v448_v46 }
 0x173   : > { %478 = vst [vmem:[%s938_s17 + $0x48] sm:$0xff] %v449_v48 }
 0x178   : > { %v451_v50 = vpop.f32.mrf.mxu2 }
 0x179   : > { %v452_v51 = vadd.f32 %v674_v25, %v451_v50 }
 0x17b   : > { %479 = vst [vmem:[%s938_s17 + $0x50] sm:$0xff] %v452_v51 }
 0x180   : > { %v454_v52 = vpop.f32.mrf.mxu2 }
 0x181   : > { %v455_v53 = vadd.f32 %v674_v25, %v454_v52 }
 0x183   : > { %480 = vst [vmem:[%s938_s17 + $0x58] sm:$0xff] %v455_v53 }
 0x188   : > { %v457_v54 = vpop.f32.mrf.mxu2 }
 0x189   : > { %v458_v55 = vadd.f32 %v674_v25, %v457_v54 }
 0x18b   : > { %481 = vst [vmem:[%s938_s17 + $0x60] sm:$0xff] %v458_v55 }
 0x190   : > { %v460_v56 = vpop.f32.mrf.mxu2 }
 0x191   : > { %v461_v57 = vadd.f32 %v674_v25, %v460_v56 }
 0x193   : > { %482 = vst [vmem:[%s938_s17 + $0x68] sm:$0xff] %v461_v57 }
 0x194   : > { %702 = shalt.err (!%p699_p3)
}
 0x195   : > { %s739_s13 = smov 128   ;;  %s740_s16 = smov 8  }
 0x196   : > { %632 = dma.vmem_to_hbm [thread:$0]  (%p809_p5), %s499_s6, 2048, %s501_s8, %s486_s9, %s739_s13, %s739_s13, %s740_s16  }
 0x197 PF: > { %p638_p4 = scmp.ge.s32.totalorder %s737_s21, 2  ;;  %s515_s17 = sand.u32 1, %s725_s18  }
 0x198   : > { %s516_s23 = scalar_lea.sflag [#allocation3], %s515_s17 }
 0x199   : > { %p635_p7 = pnand %p638_p4, %p813_p6 }
 0x19b   : > { %p636_p8 = pneg %p635_p7 }
 0x19d   : > { %720 = dma.done.wait (%p636_p8), %s516_s23, 2048  }
 0x19e   : > { %722 = vsyncadd (%p636_p8), %s516_s23, 4294965248  ;;  %p15_p9 = scmp.ge.s32.totalorder %s796_s24, 4   ;;  %s998_s18 = smov %s729_s19 }
 0x19f   : > { %s999_s19 = smov %s733_s20  ;;  %s1000_s20 = smov %s807_s27 }
 0x1a0   : > { %s1001_s21 = smov %s796_s24  ;;  %17 = sbr.rel (!%p15_p9) target bundleno = 3 (0x3), region = 75 }
 0x1a5   :  { %522 = vsyncpa [#allocation3], 1 }
 0x1a6   :  { %524 = vsyncpa [#allocation3 + $0x1], 1 }

// kernel: tpu_custom_call.1
= control target key start
LH: loop header
LB: loop body
LE: loop exit
PB: predicated region body
PF: predicated region fallthrough
CT: control target
= control target key end

     0   :  { %10 = vsyncpa [#allocation3], 0  ;;  %s990_s0 = inlined_call_operand.vmem [shape: f32[256,64], index: 0, kind: input, shape index: {}]   ;;  %s991_s1 = inlined_call_operand.vmem [shape: f32[64,128], index: 1, kind: input, shape index: {}]   ;;  %s992_s2 = inlined_call_operand.vmem [shape: f32[1,128], index: 2, kind: input, shape index: {}]   ;;  %s993_s3 = inlined_call_operand.vmem [shape: f32[128,128], index: 3, kind: input, shape index: {}]   ;;  %s994_s4 = inlined_call_operand.vmem [shape: f32[1,128], index: 4, kind: input, shape index: {}]   ;;  %s995_s5 = inlined_call_operand.hbm [shape: f32[256,128], index: 5, kind: output, shape index: {}]  }
   0x1   :  { %12 = vsyncpa [#allocation3 + $0x1], 0  ;;  %s771_s18 = smov 0   ;;  %s773_s19 = smov 0  }
   0x2   :  { %s775_s20 = smov 0   ;;  %s777_s21 = smov 0  }
   0x3 LB: > { %s792_s22 = sadd.s32 4294967295, %s737_s21   ;;  %s563_s23 = sadd.s32 4294967294, %s737_s21   ;;  %s737_s21 = sphi %s777_s21, %s1001_s21   ;;  %s733_s20 = sphi %s775_s20, %s1000_s20   ;;  %s729_s19 = sphi %s773_s19, %s999_s19   ;;  %s725_s18 = sphi %s771_s18, %s998_s18  }
   0x4   : > { %s796_s24 = sadd.s32 1, %s737_s21   ;;  %s135_s25 = sadd.s32 1, %s733_s20 }
   0x5   : > { %s132_s26 = ssub.s32 %s737_s21, %s796_s24  ;;  %p145_p0 = scmp.ne.s32.totalorder %s733_s20, %s729_s19 }
   0x6   : > { %p133_p1 = scmp.eq.s32.totalorder %s132_s26, 0  ;;  %p146_p2 = scmp.eq.s32.totalorder %s792_s22, 1 }
   0x7   : > { %p151_p3 = scmp.ne.s32.totalorder %s729_s19, %s725_s18  ;;  %p152_p4 = scmp.eq.s32.totalorder %s563_s23, 1 }
   0x8   : > { %s807_s27 = scalar_select %p133_p1, %s733_s20, %s135_s25  }
   0x9   : > { %p809_p5 = por %p146_p2, %p145_p0  ;;  %p813_p6 = por %p152_p4, %p151_p3 }
   0xa   : > { %p566_p7 = scmp.ge.s32.totalorder %s737_s21, 1  ;;  %p191_p8 = scmp.lt.s32.totalorder %s737_s21, 3 }
   0xc   : > { %p192_p9 = pnand %p566_p7, %p191_p8 }
   0xd   : > { %s568_s9 = sshll.u32 (!%p192_p9), %s792_s22, 4  ;;  %s216_s13 = sand.u32 (!%p192_p9), 1, %s729_s19  }
   0xe   : > { %195 = sbr.rel (%p192_p9) target bundleno = 407 (0x197), region = 40  ;;  %p220_p10 = scmp.lt.s32.totalorder (!%p192_p9), %s568_s9, 31 }
   0xf   : > { %s567_s14 = sshll.u32 (!%p192_p9), %s216_s13, 7  ;;  %s591_s23 = sshll.u32 (!%p192_p9), %s792_s22, 7 }
  0x10   : > { %s938_s17 = scalar_lea.vmem (!%p192_p9), [#allocation2], %s567_s14  ;;  %s497_s30 = scalar_lea.hbm (!%p192_p9), %s995_s5, %s591_s23 }
  0x11   : > { %s498_s6 = sshll.u32 (!%p192_p9), %s938_s17, 4  ;;  %s500_s8 = sshll.u32 (!%p192_p9), %s497_s30, 4  ;;  %s499_s6 = int_to_ptr.vmem [resolvable:$true] %s498_s6  ;;  %s501_s8 = int_to_ptr.hbm [resolvable:$true] %s500_s8 }
  0x12   : > { %s695_s12 = scalar_lea.hbm (!%p192_p9), %s995_s5, 256 }
  0x13   : > { %v249_v0 = vld [vmem:[%s991_s1 + $0x38] sm:$0xff]  ;;  %v248_v1 = vld [vmem:[%s991_s1 + $0x30] sm:$0xff]  ;;  %v247_v2 = vld [vmem:[%s991_s1 + $0x28] sm:$0xff]  ;;  %s1003_s9 = smov (!%p220_p10, %s568_s9), 31  ;;  %vm254_vm0 = vcmask 523264  }
  0x14   : > { %311 = vmatpush.msra.mxu0 %v249_v0  ;;  %592 = vmatpush.msra.mxu3 %v249_v0  ;;  %v246_v3 = vld [vmem:[%s991_s1 + $0x20] sm:$0xff]  ;;  %v245_v4 = vld [vmem:[%s991_s1 + $0x18] sm:$0xff]  ;;  %s569_s16 = sshll.u32 %s1003_s9, 3  ;;  %v244_v5 = vld [vmem:[%s991_s1 + $0x10] sm:$0xff]  ;;  %s486_s9 = scalar_lea.sflag [#allocation3], %s216_s13 }
  0x15   : > { %v243_v6 = vld [vmem:[%s991_s1 + $0x8] sm:$0xff]  ;;  %s844_s7 = scalar_lea.vmem %s990_s0, %s569_s16  ;;  %v242_v7 = vld [vmem:[%s991_s1] sm:$0xff]  ;;  %v399_v16 = vld [vmem:[%s993_s3 + $0x78] sm:$0xff] }
  0x16   : > { %312 = vmatpush.msra.mxu0 %v248_v1  ;;  %593 = vmatpush.msra.mxu3 %v248_v1  ;;  %v226_v8 = vld [vmem:[%s844_s7] sm:$0xff]  ;;  %v227_v9 = vld [vmem:[%s844_s7 + $0x8] sm:$0xff]  ;;  %v228_v10 = vld [vmem:[%s844_s7 + $0x10] sm:$0xff] }
  0x17   : > { %v235_v11 = vld [vmem:[%s844_s7 + $0x48] sm:$0xff]  ;;  %v229_v12 = vld [vmem:[%s844_s7 + $0x18] sm:$0xff]  ;;  %v236_v13 = vld [vmem:[%s844_s7 + $0x50] sm:$0xff]  ;;  %404 = vmatpush.msra.mxu1 %v399_v16  ;;  %600 = vmatpush.msra.mxu2 %v399_v16 }
  0x18   : > { %313 = vmatpush.msra.mxu0 %v247_v2  ;;  %594 = vmatpush.msra.mxu3 %v247_v2  ;;  %v230_v14 = vld [vmem:[%s844_s7 + $0x20] sm:$0xff]  ;;  %v237_v15 = vld [vmem:[%s844_s7 + $0x58] sm:$0xff]  ;;  %v398_v17 = vld [vmem:[%s993_s3 + $0x70] sm:$0xff] }
  0x19   : > { %v397_v18 = vld [vmem:[%s993_s3 + $0x68] sm:$0xff]  ;;  %405 = vmatpush.msra.mxu1 %v398_v17  ;;  %602 = vmatpush.msra.mxu2 %v398_v17  ;;  %v396_v20 = vld [vmem:[%s993_s3 + $0x60] sm:$0xff]  ;;  %v395_v22 = vld [vmem:[%s993_s3 + $0x58] sm:$0xff] }
  0x1a   : > { %314 = vmatpush.msra.mxu0 %v246_v3  ;;  %595 = vmatpush.msra.mxu3 %v246_v3  ;;  %v231_v19 = vld [vmem:[%s844_s7 + $0x28] sm:$0xff]  ;;  %v238_v21 = vld [vmem:[%s844_s7 + $0x60] sm:$0xff]  ;;  %v394_v23 = vld [vmem:[%s993_s3 + $0x50] sm:$0xff] }
  0x1b   : > { %406 = vmatpush.msra.mxu1 %v397_v18  ;;  %604 = vmatpush.msra.mxu2 %v397_v18  ;;  %v393_v24 = vld [vmem:[%s993_s3 + $0x48] sm:$0xff]  ;;  %v232_v25 = vld [vmem:[%s844_s7 + $0x30] sm:$0xff]  ;;  %v392_v26 = vld [vmem:[%s993_s3 + $0x40] sm:$0xff] }
  0x1c   : > { %315 = vmatpush.msra.mxu0 %v245_v4  ;;  %596 = vmatpush.msra.mxu3 %v245_v4  ;;  %v239_v27 = vld [vmem:[%s844_s7 + $0x68] sm:$0xff]  ;;  %v391_v28 = vld [vmem:[%s993_s3 + $0x38] sm:$0xff]  ;;  %v390_v29 = vld [vmem:[%s993_s3 + $0x30] sm:$0xff] }
  0x1d   : > { %407 = vmatpush.msra.mxu1 %v396_v20  ;;  %606 = vmatpush.msra.mxu2 %v396_v20  ;;  %v389_v30 = vld [vmem:[%s993_s3 + $0x28] sm:$0xff]  ;;  %v233_v31 = vld [vmem:[%s844_s7 + $0x38] sm:$0xff]  ;;  %v388_v32 = vld [vmem:[%s993_s3 + $0x20] sm:$0xff] }
  0x1e   : > { %316 = vmatpush.msra.mxu0 %v244_v5  ;;  %597 = vmatpush.msra.mxu3 %v244_v5  ;;  %v240_v33 = vld [vmem:[%s844_s7 + $0x70] sm:$0xff]  ;;  %v387_v34 = vld [vmem:[%s993_s3 + $0x18] sm:$0xff]  ;;  %v234_v35 = vld [vmem:[%s844_s7 + $0x40] sm:$0xff] }
  0x1f   : > { %408 = vmatpush.msra.mxu1 %v395_v22  ;;  %608 = vmatpush.msra.mxu2 %v395_v22  ;;  %v241_v36 = vld [vmem:[%s844_s7 + $0x78] sm:$0xff]  ;;  %v386_v37 = vld [vmem:[%s993_s3 + $0x10] sm:$0xff]  ;;  %v385_v38 = vld [vmem:[%s993_s3 + $0x8] sm:$0xff]  ;;  %s689_s7 = sshra.s32 %s501_s8, 4  ;;  %s690_s7 = int_to_ptr.hbm [resolvable:$true] %s689_s7 }
  0x20   : > { %317 = vmatpush.msra.mxu0 %v243_v6  ;;  %598 = vmatpush.msra.mxu3 %v243_v6  ;;  %v384_v39 = vld [vmem:[%s993_s3] sm:$0xff]  ;;  %s691_s22 = scalar_lea.hbm %s690_s7, 128  ;;  %p696_p0 = scmp.lt.s32.totalorder %s690_s7, %s995_s5 }
  0x21   : > { %409 = vmatpush.msra.mxu1 %v394_v23  ;;  %610 = vmatpush.msra.mxu2 %v394_v23  ;;  %v673_v40 = vld [vmem:[%s992_s2] ss:$0 sm:$0xff]  ;;  %p692_p11 = scmp.ne.s32.totalorder %s690_s7, %s691_s22  ;;  %p697_p1 = scmp.lt.s32.totalorder %s695_s12, %s691_s22 }
  0x22   : > { %318 = vmatpush.msra.mxu0 %v242_v7  ;;  %599 = vmatpush.msra.mxu3 %v242_v7 }
  0x23   : > { %570 = vmatmul.msk.f32.vlgmr.msra.gmra.mxu0 %vm254_vm0, %v226_v8  ;;  %579 = vmatmul.msk.f32.vlgmr.msra.gmra.mxu3 %vm254_vm0, %v235_v11  ;;  %p693_p12 = pnand %p692_p11, %p809_p5  ;;  %p698_p2 = por %p697_p1, %p696_p0 }
  0x24   : > { %601 = vmatpush.msrb.mxu3 %v399_v16  ;;  %410 = vmatpush.msra.mxu1 %v393_v24 }
  0x25   : > { %612 = vmatpush.msra.mxu2 %v393_v24  ;;  %p694_p13 = pneg %p693_p12 }
  0x26   : > { %603 = vmatpush.msrb.mxu3 %v398_v17  ;;  %411 = vmatpush.msra.mxu1 %v392_v26 }
  0x27   : > { %614 = vmatpush.msra.mxu2 %v392_v26  ;;  %p699_p3 = pnand %p698_p2, %p694_p13 }
  0x28   : > { %605 = vmatpush.msrb.mxu3 %v397_v18  ;;  %412 = vmatpush.msra.mxu1 %v391_v28 }
  0x29   : > { %616 = vmatpush.msra.mxu2 %v391_v28 }
  0x2a   : > { %607 = vmatpush.msrb.mxu3 %v396_v20  ;;  %413 = vmatpush.msra.mxu1 %v390_v29 }
  0x2b   : > { %571 = vmatmul.msk.f32.gmra.mxu0 %vm254_vm0, %v227_v9  ;;  %580 = vmatmul.msk.f32.gmra.mxu3 %vm254_vm0, %v236_v13 }
  0x2c   : > { %609 = vmatpush.msrb.mxu3 %v395_v22  ;;  %618 = vmatpush.msra.mxu2 %v390_v29 }
  0x2d   : > { %414 = vmatpush.msra.mxu1 %v389_v30 }
  0x2e   : > { %611 = vmatpush.msrb.mxu3 %v394_v23  ;;  %620 = vmatpush.msra.mxu2 %v389_v30 }
  0x2f   : > { %415 = vmatpush.msra.mxu1 %v388_v32 }
  0x30   : > { %613 = vmatpush.msrb.mxu3 %v393_v24  ;;  %622 = vmatpush.msra.mxu2 %v388_v32 }
  0x31   : > { %416 = vmatpush.msra.mxu1 %v387_v34 }
  0x32   : > { %615 = vmatpush.msrb.mxu3 %v392_v26  ;;  %624 = vmatpush.msra.mxu2 %v387_v34 }
  0x33   : > { %572 = vmatmul.msk.f32.gmra.mxu0 %vm254_vm0, %v228_v10  ;;  %581 = vmatmul.msk.f32.gmra.mxu3 %vm254_vm0, %v237_v15 }
  0x34   : > { %617 = vmatpush.msrb.mxu3 %v391_v28  ;;  %417 = vmatpush.msra.mxu1 %v386_v37 }
  0x35   : > { %626 = vmatpush.msra.mxu2 %v386_v37 }
  0x36   : > { %619 = vmatpush.msrb.mxu3 %v390_v29  ;;  %418 = vmatpush.msra.mxu1 %v385_v38 }
  0x37   : > { %628 = vmatpush.msra.mxu2 %v385_v38 }
  0x38   : > { %621 = vmatpush.msrb.mxu3 %v389_v30  ;;  %419 = vmatpush.msra.mxu1 %v384_v39 }
  0x39   : > { %630 = vmatpush.msra.mxu2 %v384_v39 }
  0x3a   : > { %623 = vmatpush.msrb.mxu3 %v388_v32 }
  0x3b   : > { %573 = vmatmul.msk.f32.gmra.mxu0 %vm254_vm0, %v229_v12  ;;  %582 = vmatmul.msk.f32.gmra.mxu3 %vm254_vm0, %v238_v21 }
  0x3c   : > { %625 = vmatpush.msrb.mxu3 %v387_v34 }
  0x3e   : > { %627 = vmatpush.msrb.mxu3 %v386_v37 }
  0x40   : > { %629 = vmatpush.msrb.mxu3 %v385_v38 }
  0x42   : > { %631 = vmatpush.msrb.mxu3 %v384_v39 }
  0x43   : > { %574 = vmatmul.msk.f32.gmra.mxu0 %vm254_vm0, %v230_v14  ;;  %583 = vmatmul.msk.f32.gmra.mxu3 %vm254_vm0, %v239_v27 }
  0x4b   : > { %575 = vmatmul.msk.f32.gmra.mxu0 %vm254_vm0, %v231_v19  ;;  %584 = vmatmul.msk.f32.gmra.mxu3 %vm254_vm0, %v240_v33 }
  0x53   : > { %576 = vmatmul.msk.f32.gmra.mxu0 %vm254_vm0, %v232_v25  ;;  %585 = vmatmul.msk.f32.gmra.mxu3 %vm254_vm0, %v241_v36  ;;  %v674_v25 = vld [vmem:[%s994_s4] ss:$0 sm:$0xff] }
  0x5b   : > { %577 = vmatmul.msk.f32.gmra.mxu0 %vm254_vm0, %v233_v31 }
  0x63   : > { %578 = vmatmul.msk.f32.gmra.mxu0 %vm254_vm0, %v234_v35 }
  0xa0   : > { %v320_v41 = vpop.f32.mrf.mxu0 }
  0xa1   : > { %v321_v42 = vadd.f32 %v673_v40, %v320_v41 }
  0xa3   : > { %v368_v43 = vmax.f32 %v321_v42, 0.0 }
  0xa5   : > { %420 = vmatmul.f32.vlgmr.msra.gmra.mxu1 %v368_v43 }
  0xa6   : > { %v347_v51 = vpop.f32.mrf.mxu3 }
  0xa7   : > { %v348_v12 = vadd.f32 %v673_v40, %v347_v51 }
  0xa8   : > { %v323_v44 = vpop.f32.mrf.mxu0 }
  0xa9   : > { %v324_v45 = vadd.f32 %v673_v40, %v323_v44  ;;  %v377_v15 = vmax.f32 %v348_v12, 0.0 }
  0xab   : > { %v369_v46 = vmax.f32 %v324_v45, 0.0 }
  0xad   : > { %423 = vmatmul.f32.gmra.mxu1 %v369_v46 }
  0xae   : > { %v350_v55 = vpop.f32.mrf.mxu3 }
  0xaf   : > { %v351_v17 = vadd.f32 %v673_v40, %v350_v55 }
  0xb0   : > { %v326_v47 = vpop.f32.mrf.mxu0 }
  0xb1   : > { %v327_v48 = vadd.f32 %v673_v40, %v326_v47  ;;  %v378_v18 = vmax.f32 %v351_v17, 0.0 }
  0xb3   : > { %v370_v49 = vmax.f32 %v327_v48, 0.0 }
  0xb5   : > { %426 = vmatmul.f32.gmra.mxu1 %v370_v49 }
  0xb6   : > { %v353_v59 = vpop.f32.mrf.mxu3 }
  0xb7   : > { %v354_v19 = vadd.f32 %v673_v40, %v353_v59 }
  0xb8   : > { %v329_v50 = vpop.f32.mrf.mxu0 }
  0xb9   : > { %v330_v52 = vadd.f32 %v673_v40, %v329_v50  ;;  %v379_v20 = vmax.f32 %v354_v19, 0.0 }
  0xbb   : > { %v371_v53 = vmax.f32 %v330_v52, 0.0 }
  0xbd   : > { %429 = vmatmul.f32.gmra.mxu1 %v371_v53 }
  0xbe   : > { %v356_v63 = vpop.f32.mrf.mxu3 }
  0xbf   : > { %v357_v21 = vadd.f32 %v673_v40, %v356_v63 }
  0xc0   : > { %v332_v54 = vpop.f32.mrf.mxu0 }
  0xc1   : > { %v333_v56 = vadd.f32 %v673_v40, %v332_v54  ;;  %v380_v22 = vmax.f32 %v357_v21, 0.0 }
  0xc3   : > { %v372_v57 = vmax.f32 %v333_v56, 0.0 }
  0xc5   : > { %432 = vmatmul.f32.gmra.mxu1 %v372_v57 }
  0xc6   : > { %v359_v3 = vpop.f32.mrf.mxu3 }
  0xc7   : > { %v360_v23 = vadd.f32 %v673_v40, %v359_v3 }
  0xc8   : > { %v335_v58 = vpop.f32.mrf.mxu0 }
  0xc9   : > { %v336_v60 = vadd.f32 %v673_v40, %v335_v58  ;;  %v381_v24 = vmax.f32 %v360_v23, 0.0 }
  0xcb   : > { %v373_v61 = vmax.f32 %v336_v60, 0.0 }
  0xcd   : > { %435 = vmatmul.f32.gmra.mxu1 %v373_v61 }
  0xce   : > { %v362_v7 = vpop.f32.mrf.mxu3 }
  0xcf   : > { %v363_v9 = vadd.f32 %v673_v40, %v362_v7 }
  0xd0   : > { %v338_v62 = vpop.f32.mrf.mxu0 }
  0xd1   : > { %v339_v0 = vadd.f32 %v673_v40, %v338_v62  ;;  %v382_v11 = vmax.f32 %v363_v9, 0.0 }
  0xd3   : > { %v374_v1 = vmax.f32 %v339_v0, 0.0  ;;  %462 = vmatmul.f32.vlgmr.msrb.gmra.mxu3 %v382_v11 }
  0xd5   : > { %438 = vmatmul.f32.gmra.mxu1 %v374_v1 }
  0xd6   : > { %v365_v13 = vpop.f32.mrf.mxu3 }
  0xd7   : > { %v366_v14 = vadd.f32 %v673_v40, %v365_v13 }
  0xd8   : > { %v341_v2 = vpop.f32.mrf.mxu0 }
  0xd9   : > { %v342_v4 = vadd.f32 %v673_v40, %v341_v2  ;;  %v383_v16 = vmax.f32 %v366_v14, 0.0 }
  0xdb   : > { %v375_v5 = vmax.f32 %v342_v4, 0.0  ;;  %465 = vmatmul.f32.gmra.mxu3 %v383_v16 }
  0xdd   : > { %441 = vmatmul.f32.vlgmr.msra.gmra.mxu2 %v375_v5 }
  0xe0   : > { %v344_v6 = vpop.f32.mrf.mxu0 }
  0xe1   : > { %v345_v8 = vadd.f32 %v673_v40, %v344_v6 }
  0xe3   : > { %v376_v10 = vmax.f32 %v345_v8, 0.0 }
  0xe5   : > { %444 = vmatmul.f32.gmra.mxu2 %v376_v10 }
  0xed   : > { %447 = vmatmul.f32.gmra.mxu2 %v377_v15 }
  0xf5   : > { %450 = vmatmul.f32.gmra.mxu2 %v378_v18 }
  0xfd   : > { %453 = vmatmul.f32.gmra.mxu2 %v379_v20 }
 0x105   : > { %456 = vmatmul.f32.gmra.mxu2 %v380_v22 }
 0x10d   : > { %459 = vmatmul.f32.gmra.mxu2 %v381_v24 }
 0x122   : > { %v421_v26 = vpop.f32.mrf.mxu1 }
 0x123   : > { %v422_v27 = vadd.f32 %v674_v25, %v421_v26 }
 0x125   : > { %469 = vst [vmem:[%s938_s17] sm:$0xff] %v422_v27 }
 0x12a   : > { %v424_v28 = vpop.f32.mrf.mxu1 }
 0x12b   : > { %v425_v29 = vadd.f32 %v674_v25, %v424_v28 }
 0x12d   : > { %470 = vst [vmem:[%s938_s17 + $0x8] sm:$0xff] %v425_v29 }
 0x132   : > { %v427_v30 = vpop.f32.mrf.mxu1 }
 0x133   : > { %v428_v31 = vadd.f32 %v674_v25, %v427_v30 }
 0x135   : > { %471 = vst [vmem:[%s938_s17 + $0x10] sm:$0xff] %v428_v31 }
 0x13a   : > { %v430_v32 = vpop.f32.mrf.mxu1 }
 0x13b   : > { %v431_v33 = vadd.f32 %v674_v25, %v430_v32 }
 0x13d   : > { %472 = vst [vmem:[%s938_s17 + $0x18] sm:$0xff] %v431_v33 }
 0x142   : > { %v433_v34 = vpop.f32.mrf.mxu1 }
 0x143   : > { %v434_v35 = vadd.f32 %v674_v25, %v433_v34 }
 0x145   : > { %473 = vst [vmem:[%s938_s17 + $0x20] sm:$0xff] %v434_v35 }
 0x14a   : > { %v436_v36 = vpop.f32.mrf.mxu1 }
 0x14b   : > { %v437_v37 = vadd.f32 %v674_v25, %v436_v36 }
 0x14d   : > { %474 = vst [vmem:[%s938_s17 + $0x28] sm:$0xff] %v437_v37 }
 0x152   : > { %v439_v38 = vpop.f32.mrf.mxu1 }
 0x153   : > { %v440_v39 = vadd.f32 %v674_v25, %v439_v38 }
 0x155   : > { %475 = vst [vmem:[%s938_s17 + $0x30] sm:$0xff] %v440_v39 }
 0x156   : > { %v463_v43 = vpop.f32.mrf.mxu3 }
 0x157   : > { %v464_v45 = vadd.f32 %v674_v25, %v463_v43 }
 0x159   : > { %483 = vst [vmem:[%s938_s17 + $0x70] sm:$0xff] %v464_v45 }
 0x15e   : > { %v466_v47 = vpop.f32.mrf.mxu3 }
 0x15f   : > { %v467_v49 = vadd.f32 %v674_v25, %v466_v47 }
 0x160   : > { %v442_v40 = vpop.f32.mrf.mxu2 }
 0x161   : > { %v443_v41 = vadd.f32 %v674_v25, %v442_v40  ;;  %484 = vst [vmem:[%s938_s17 + $0x78] sm:$0xff] %v467_v49 }
 0x163   : > { %476 = vst [vmem:[%s938_s17 + $0x38] sm:$0xff] %v443_v41 }
 0x168   : > { %v445_v42 = vpop.f32.mrf.mxu2 }
 0x169   : > { %v446_v44 = vadd.f32 %v674_v25, %v445_v42 }
 0x16b   : > { %477 = vst [vmem:[%s938_s17 + $0x40] sm:$0xff] %v446_v44 }
 0x170   : > { %v448_v46 = vpop.f32.mrf.mxu2 }
 0x171   : > { %v449_v48 = vadd.f32 %v674_v25, %v448_v46 }
 0x173   : > { %478 = vst [vmem:[%s938_s17 + $0x48] sm:$0xff] %v449_v48 }
 0x178   : > { %v451_v50 = vpop.f32.mrf.mxu2 }
 0x179   : > { %v452_v51 = vadd.f32 %v674_v25, %v451_v50 }
 0x17b   : > { %479 = vst [vmem:[%s938_s17 + $0x50] sm:$0xff] %v452_v51 }
 0x180   : > { %v454_v52 = vpop.f32.mrf.mxu2 }
 0x181   : > { %v455_v53 = vadd.f32 %v674_v25, %v454_v52 }
 0x183   : > { %480 = vst [vmem:[%s938_s17 + $0x58] sm:$0xff] %v455_v53 }
 0x188   : > { %v457_v54 = vpop.f32.mrf.mxu2 }
 0x189   : > { %v458_v55 = vadd.f32 %v674_v25, %v457_v54 }
 0x18b   : > { %481 = vst [vmem:[%s938_s17 + $0x60] sm:$0xff] %v458_v55 }
 0x190   : > { %v460_v56 = vpop.f32.mrf.mxu2 }
 0x191   : > { %v461_v57 = vadd.f32 %v674_v25, %v460_v56 }
 0x193   : > { %482 = vst [vmem:[%s938_s17 + $0x68] sm:$0xff] %v461_v57 }
 0x194   : > { %702 = shalt.err (!%p699_p3)
}
 0x195   : > { %s739_s13 = smov 128   ;;  %s740_s16 = smov 8  }
 0x196   : > { %632 = dma.vmem_to_hbm [thread:$0]  (%p809_p5), %s499_s6, 2048, %s501_s8, %s486_s9, %s739_s13, %s739_s13, %s740_s16  }
 0x197 PF: > { %p638_p4 = scmp.ge.s32.totalorder %s737_s21, 2  ;;  %s515_s17 = sand.u32 1, %s725_s18  }
 0x198   : > { %s516_s23 = scalar_lea.sflag [#allocation3], %s515_s17 }
 0x199   : > { %p635_p7 = pnand %p638_p4, %p813_p6 }
 0x19b   : > { %p636_p8 = pneg %p635_p7 }
 0x19d   : > { %720 = dma.done.wait (%p636_p8), %s516_s23, 2048  }
 0x19e   : > { %722 = vsyncadd (%p636_p8), %s516_s23, 4294965248  ;;  %p15_p9 = scmp.ge.s32.totalorder %s796_s24, 4   ;;  %s998_s18 = smov %s729_s19 }
 0x19f   : > { %s999_s19 = smov %s733_s20  ;;  %s1000_s20 = smov %s807_s27 }
 0x1a0   : > { %s1001_s21 = smov %s796_s24  ;;  %17 = sbr.rel (!%p15_p9) target bundleno = 3 (0x3), region = 75 }
 0x1a5   :  { %522 = vsyncpa [#allocation3], 1 }
 0x1a6   :  { %524 = vsyncpa [#allocation3 + $0x1], 1 }

</bundles_post_ra>
